<compile_context>
chip_gen: v5e
topology: v5e:2x2
jax: 0.10.0
libtpu: 0.0.40
codegen_flags: <defaults>
</compile_context>

<pallas_src>
import jax
import jax.numpy as jnp
from jax.experimental import pallas as pl
from jax.experimental.pallas import tpu as pltpu


# ----------------------------- Pallas kernel ------------------------------ #
def encoder_lstm_kernel(ids_ref, len_ref, proj_ref, w_hh_ref, b_ref,
                        out_ref, hc_ref):
    """Fused embedding-gather + single-layer LSTM recurrence, length-masked.

    ids_ref  : (T*B, 1) i32    token ids, time-major flattened (row = t*B + b)
    len_ref  : (B, 1)   i32    sequence lengths (0 for batch-pad rows)
    proj_ref : (V, 4H)  f32    precomputed emb @ W_ih (row 0 = padding row)
    w_hh_ref : (H, 4H)  bf16   hidden->gates weights (pre-transposed)
    b_ref    : (1, 4H)  f32    b_ih + b_hh
    out_ref  : (B, T*H) f32    per-step hidden states (lane-dense slab)
    hc_ref   : (B, HCW) f32    [h | c | pad] final states (lane-dense slab)
    """
    TB = ids_ref.shape[0]
    B = len_ref.shape[0]
    T = TB // B
    V, four_h = proj_ref.shape
    H = four_h // 4

    # --- embedding lookup + input projection for all timesteps at once ------
    # one_hot(ids) @ (emb @ W_ih) == embedding(ids) @ W_ih   (exact selection)
    ids = ids_ref[...]                                              # (T*B, 1)
    onehot = (ids == jax.lax.broadcasted_iota(jnp.int32, (TB, V), 1)
              ).astype(jnp.float32)                                 # (T*B, V)
    # Bias broadcast hoisted (added once, not per step).
    xg = jnp.dot(onehot, proj_ref[...],
                 preferred_element_type=jnp.float32) + b_ref[...]   # (T*B, 4H)

    # TODO(synk): keep W_hh resident in the MXU across the unrolled steps via
    # pltpu.matmul_push_rhs / matmul_acc_lhs / matmul_pop once verified that
    # Mosaic does not already hoist the (32, 128) RHS load out of the T
    # identical dots.
    w_hh = w_hh_ref[...]                                            # (H,4H) bf16
    lengths = len_ref[...]                                          # (B, 1)

    # Flush outputs in full-128-lane groups (unmasked vst, bounded live vregs).
    if H <= 128 and 128 % H == 0:
        group = 128 // H
    else:
        group = 1

    h = jnp.zeros((B, H), jnp.float32)
    c = jnp.zeros((B, H), jnp.float32)
    buf = []
    col = 0
    for t in range(T):  # T is small & static: full unroll, static slices
        # bf16 x bf16 -> f32 accumulate: single-pass MXU on the serial chain.
        gates = xg[t * B:(t + 1) * B, :] + jnp.dot(
            h.astype(jnp.bfloat16), w_hh,
            preferred_element_type=jnp.float32)                     # (B, 4H)
        sig = jax.nn.sigmoid(gates)      # full-row EUP pass
        tnh = jnp.tanh(gates)            # full-row EUP pass
        i_g = sig[:, 0 * H:1 * H]
        f_g = sig[:, 1 * H:2 * H]
        g_g = tnh[:, 2 * H:3 * H]
        o_g = sig[:, 3 * H:4 * H]

        c_new = f_g * c + i_g * g_g
        h_new = o_g * jnp.tanh(c_new)

        valid = t < lengths                                         # (B,1) bool
        c = jnp.where(valid, c_new, c)
        h = jnp.where(valid, h_new, h)
        buf.append(jnp.where(valid, h_new, jnp.zeros_like(h_new)))

        if len(buf) == group or t == T - 1:
            blk = jnp.concatenate(buf, axis=1) if len(buf) > 1 else buf[0]
            out_ref[:, col:col + blk.shape[1]] = blk
            col += blk.shape[1]
            buf = []

    # Lane-dense final-state write: one unmasked store of [h | c | pad].
    hc_w = hc_ref.shape[1]
    pad = hc_w - 2 * H
    pieces = [h, c]
    if pad > 0:
        pieces.append(jnp.zeros((B, pad), jnp.float32))
    hc_ref[...] = jnp.concatenate(pieces, axis=1)


# ------------------------------- wrapper ----------------------------------- #
def init_encoder_params(key, input_size, embedding_dim, hidden_size):
    """Deterministic init mirroring nn.Embedding / nn.LSTM shapes.

    Also precomputes:
      proj       = embedding @ W_ih^T  (V, 4H) — hoisted out of the kernel
      w_hh_t_bf16 = W_hh^T in bf16     (H, 4H) — single-pass MXU recurrence
    """
    k_emb, k_wih, k_whh, k_bih, k_bhh = jax.random.split(key, 5)
    emb = jax.random.normal(k_emb, (input_size, embedding_dim), jnp.float32)
    emb = emb.at[0].set(0.0)  # padding_idx=0

    bound = 1.0 / jnp.sqrt(jnp.float32(hidden_size))
    # PyTorch stores weight_ih_l0 as (4H, E); keep that shape then transpose.
    w_ih = jax.random.uniform(k_wih, (4 * hidden_size, embedding_dim),
                              jnp.float32, -bound, bound)
    w_hh = jax.random.uniform(k_whh, (4 * hidden_size, hidden_size),
                              jnp.float32, -bound, bound)
    b_ih = jax.random.uniform(k_bih, (4 * hidden_size,), jnp.float32,
                              -bound, bound)
    b_hh = jax.random.uniform(k_bhh, (4 * hidden_size,), jnp.float32,
                              -bound, bound)
    w_ih_t = jnp.transpose(w_ih)                        # (E, 4H)
    w_hh_t = jnp.transpose(w_hh)                        # (H, 4H)
    return {
        "embedding": emb,
        "w_ih_t": w_ih_t,
        "w_hh_t": w_hh_t,
        "bias": (b_ih + b_hh).reshape(1, -1),           # (1, 4H)
        # Kernel-side constants, computed once (not per forward call):
        "proj": jnp.dot(emb, w_ih_t,
                        preferred_element_type=jnp.float32),   # (V, 4H)
        "w_hh_t_bf16": w_hh_t.astype(jnp.bfloat16),            # (H, 4H)
    }


def encoder_forward(params, input_seqs, input_lengths):
    """Mirrors Encoder.forward: returns (outputs, (hidden, cell)).

    input_seqs   : (B, T) int32 token ids (0 = padding)
    input_lengths: (B,)   int32 valid lengths
    outputs      : (B, T, H) f32, zero on padded positions
    hidden, cell : (1, B, H) f32 states at each sequence's last valid step
    """
    proj = params["proj"]
    B, T = input_seqs.shape
    H = params["w_hh_t"].shape[0]
    V = proj.shape[0]

    # Pad batch to a full 8-row sublane tile; pad rows get length 0.
    B_pad = ((B + 7) // 8) * 8
    ids = jnp.zeros((B_pad, T), jnp.int32).at[:B].set(
        input_seqs.astype(jnp.int32))
    lens = jnp.zeros((B_pad,), jnp.int32).at[:B].set(
        input_lengths.astype(jnp.int32))

    # Time-major flattened token ids: row index = t * B_pad + b (tiny int op).
    ids_tm = jnp.transpose(ids, (1, 0)).reshape(T * B_pad, 1)
    lengths2d = lens.reshape(B_pad, 1)

    # Lane-dense final-state slab width ([h | c | pad] -> multiple of 128).
    hc_w = max(128, ((2 * H + 127) // 128) * 128)

    vmem = pltpu.MemorySpace.VMEM
    out_shapes = (
        jax.ShapeDtypeStruct((B_pad, T * H), jnp.float32),  # outputs slab
        jax.ShapeDtypeStruct((B_pad, hc_w), jnp.float32),   # [h | c | pad]
    )

    # Advisory cost estimate for XLA's scheduler.
    flops = 2 * (T * B_pad) * V * (4 * H) + 2 * T * B_pad * H * (4 * H)
    transcendentals = T * B_pad * 9 * H          # sigmoid(4H)+tanh(4H)+tanh(H)
    bytes_accessed = (ids_tm.nbytes + lengths2d.nbytes + proj.nbytes
                      + params["w_hh_t_bf16"].nbytes + params["bias"].nbytes
                      + B_pad * T * H * 4 + B_pad * hc_w * 4)
    cost = pl.CostEstimate(flops=flops, transcendentals=transcendentals,
                           bytes_accessed=bytes_accessed)

    # NOTE(v7x): once B exceeds one sublane tile, add a batch grid axis with
    # dimension_semantics=("parallel",) to use both TensorCores; once V grows
    # large, replace the in-kernel one-hot matmul with a DMA row gather to
    # stay inside v7x's 64 MiB VMEM.
    out_flat, hc = pl.pallas_call(
        encoder_lstm_kernel,
        out_shape=out_shapes,
        in_specs=[pl.BlockSpec(memory_space=vmem)] * 5,
        out_specs=[pl.BlockSpec(memory_space=vmem)] * 2,
        cost_estimate=cost,
    )(ids_tm, lengths2d, proj, params["w_hh_t_bf16"], params["bias"])

    outputs = out_flat[:B].reshape(B, T, H)   # batch_first; reshape is free
    hidden = hc[:B, 0:H][None, ...]
    cell = hc[:B, H:2 * H][None, ...]
    return outputs, (hidden, cell)


# -------------------------- pure-JAX reference ----------------------------- #
def encoder_reference(params, input_seqs, input_lengths):
    emb = params["embedding"]
    B, T = input_seqs.shape
    H = params["w_hh_t"].shape[0]
    x = jnp.take(emb, input_seqs, axis=0)              # (B, T, E)
    w_ih_t, w_hh_t, b = params["w_ih_t"], params["w_hh_t"], params["bias"]

    h = jnp.zeros((B, H), jnp.float32)
    c = jnp.zeros((B, H), jnp.float32)
    outs = []
    for t in range(T):
        gates = x[:, t, :] @ w_ih_t + h @ w_hh_t + b
        i_g = jax.nn.sigmoid(gates[:, 0 * H:1 * H])
        f_g = jax.nn.sigmoid(gates[:, 1 * H:2 * H])
        g_g = jnp.tanh(gates[:, 2 * H:3 * H])
        o_g = jax.nn.sigmoid(gates[:, 3 * H:4 * H])
        c_new = f_g * c + i_g * g_g
        h_new = o_g * jnp.tanh(c_new)
        valid = (t < input_lengths).reshape(B, 1)
        c = jnp.where(valid, c_new, c)
        h = jnp.where(valid, h_new, h)
        outs.append(jnp.where(valid, h_new, 0.0))
    outputs = jnp.stack(outs, axis=1)
    return outputs, (h[None], c[None])


# --------------------------------- main ------------------------------------ #
if __name__ == "__main__":
    input_size = 16      # vocab
    embedding_dim = 32
    hidden_size = 32
    B, T = 2, 8

    key = jax.random.PRNGKey(0)
    k_params, k_tok = jax.random.split(key)
    params = init_encoder_params(k_params, input_size, embedding_dim,
                                 hidden_size)

    input_lengths = jnp.array([8, 5], dtype=jnp.int32)
    tokens = jax.random.randint(k_tok, (B, T), 1, input_size, dtype=jnp.int32)
    pos = jnp.arange(T)[None, :]
    input_seqs = jnp.where(pos < input_lengths[:, None], tokens, 0)  # pad=0

    outputs, (hidden, cell) = encoder_forward(params, input_seqs,
                                              input_lengths)
    jax.block_until_ready((outputs, hidden, cell))

    # pad_packed_sequence trims to max(input_lengths) (== T here).
    max_len = int(jax.device_get(input_lengths).max())
    outputs = outputs[:, :max_len]

    ref_out, (ref_h, ref_c) = encoder_reference(params, input_seqs,
                                                input_lengths)
    ref_out = ref_out[:, :max_len]
    # Tolerance loosened vs. the pure-f32 version: the recurrent matmul runs
    # in bf16 (single-pass MXU) per the performance review.
    assert jnp.allclose(outputs, ref_out, atol=5e-2, rtol=5e-2)
    assert jnp.allclose(hidden, ref_h, atol=5e-2, rtol=5e-2)
    assert jnp.allclose(cell, ref_c, atol=5e-2, rtol=5e-2)

    print("KERNEL_OK")
</pallas_src>

<mosaic_0001>
module attributes {stable_mosaic.version = 11 : i64} {
  func.func @encoder_lstm_kernel(%arg0: memref<64x1xi32, #tpu.memory_space<vmem>>, %arg1: memref<8x1xi32, #tpu.memory_space<vmem>>, %arg2: memref<16x128xf32, #tpu.memory_space<vmem>>, %arg3: memref<32x128xbf16, #tpu.memory_space<vmem>>, %arg4: memref<1x128xf32, #tpu.memory_space<vmem>>, %arg5: memref<8x256xf32, #tpu.memory_space<vmem>>, %arg6: memref<8x128xf32, #tpu.memory_space<vmem>>) attributes {dimension_semantics = [], scalar_prefetch = 0 : i64, scratch_operands = 0 : i64, tpu.core_type = #tpu.core_type<tc>} {
    %c0 = arith.constant 0 : index
    %c0_0 = arith.constant 0 : index
    %0 = vector.load %arg0[%c0, %c0_0] : memref<64x1xi32, #tpu.memory_space<vmem>>, vector<64x1xi32>
    %1 = tpu.iota {dimensions = array<i32: 1>} : vector<64x16xi32>
    %2 = vector.broadcast %0 : vector<64x1xi32> to vector<64x16xi32>
    %3 = arith.cmpi eq, %2, %1 : vector<64x16xi32>
    %4 = arith.extui %3 : vector<64x16xi1> to vector<64x16xi32>
    %5 = arith.sitofp %4 : vector<64x16xi32> to vector<64x16xf32>
    %c0_1 = arith.constant 0 : index
    %c0_2 = arith.constant 0 : index
    %6 = vector.load %arg2[%c0_1, %c0_2] : memref<16x128xf32, #tpu.memory_space<vmem>>, vector<16x128xf32>
    %cst = arith.constant dense<0.000000e+00> : vector<64x128xf32>
    %7 = tpu.matmul %5, %6, %cst {dimension_numbers = #tpu.dot_dimension_numbers<[1], [0], [0], [1], [0, 0, 1, 1], [], []>} : vector<64x16xf32>, vector<16x128xf32>, vector<64x128xf32> -> vector<64x128xf32>
    %c0_3 = arith.constant 0 : index
    %c0_4 = arith.constant 0 : index
    %8 = vector.load %arg4[%c0_3, %c0_4] : memref<1x128xf32, #tpu.memory_space<vmem>>, vector<1x128xf32>
    %9 = vector.broadcast %8 : vector<1x128xf32> to vector<64x128xf32>
    %10 = arith.addf %7, %9 : vector<64x128xf32>
    %c0_5 = arith.constant 0 : index
    %c0_6 = arith.constant 0 : index
    %11 = vector.load %arg3[%c0_5, %c0_6] : memref<32x128xbf16, #tpu.memory_space<vmem>>, vector<32x128xbf16>
    %c0_7 = arith.constant 0 : index
    %c0_8 = arith.constant 0 : index
    %12 = vector.load %arg1[%c0_7, %c0_8] : memref<8x1xi32, #tpu.memory_space<vmem>>, vector<8x1xi32>
    %cst_9 = arith.constant 0.000000e+00 : f32
    %13 = vector.broadcast %cst_9 : f32 to vector<8x32xf32>
    %cst_10 = arith.constant 0.000000e+00 : f32
    %14 = vector.broadcast %cst_10 : f32 to vector<8x32xf32>
    %15 = vector.extract_strided_slice %10 {offsets = [0, 0], sizes = [8, 128], strides = [1, 1]} : vector<64x128xf32> to vector<8x128xf32>
    %16 = arith.truncf %13 : vector<8x32xf32> to vector<8x32xbf16>
    %cst_11 = arith.constant dense<0.000000e+00> : vector<8x128xf32>
    %17 = tpu.matmul %16, %11, %cst_11 {dimension_numbers = #tpu.dot_dimension_numbers<[1], [0], [0], [1], [0, 0, 1, 1], [], []>} : vector<8x32xbf16>, vector<32x128xbf16>, vector<8x128xf32> -> vector<8x128xf32>
    %18 = arith.addf %15, %17 : vector<8x128xf32>
    %19 = arith.negf %18 : vector<8x128xf32>
    %20 = math.exp %19 : vector<8x128xf32>
    %cst_12 = arith.constant 1.000000e+00 : f32
    %21 = vector.broadcast %cst_12 : f32 to vector<8x128xf32>
    %22 = arith.addf %21, %20 : vector<8x128xf32>
    %23 = arith.divf %21, %22 : vector<8x128xf32>
    %24 = math.tanh %18 : vector<8x128xf32>
    %25 = vector.extract_strided_slice %23 {offsets = [0, 0], sizes = [8, 32], strides = [1, 1]} : vector<8x128xf32> to vector<8x32xf32>
    %26 = vector.extract_strided_slice %23 {offsets = [0, 32], sizes = [8, 32], strides = [1, 1]} : vector<8x128xf32> to vector<8x32xf32>
    %27 = vector.extract_strided_slice %24 {offsets = [0, 64], sizes = [8, 32], strides = [1, 1]} : vector<8x128xf32> to vector<8x32xf32>
    %28 = vector.extract_strided_slice %23 {offsets = [0, 96], sizes = [8, 32], strides = [1, 1]} : vector<8x128xf32> to vector<8x32xf32>
    %29 = arith.mulf %26, %14 : vector<8x32xf32>
    %30 = arith.mulf %25, %27 : vector<8x32xf32>
    %31 = arith.addf %29, %30 : vector<8x32xf32>
    %32 = math.tanh %31 : vector<8x32xf32>
    %33 = arith.mulf %28, %32 : vector<8x32xf32>
    %c0_i32 = arith.constant 0 : i32
    %34 = vector.broadcast %c0_i32 : i32 to vector<8x1xi32>
    %35 = arith.cmpi sgt, %12, %34 : vector<8x1xi32>
    %36 = vector.shape_cast %35 : vector<8x1xi1> to vector<8x1xi1>
    %37 = vector.broadcast %36 : vector<8x1xi1> to vector<8x32xi1>
    %38 = arith.select %37, %31, %14 : vector<8x32xi1>, vector<8x32xf32>
    %39 = vector.shape_cast %35 : vector<8x1xi1> to vector<8x1xi1>
    %40 = vector.broadcast %39 : vector<8x1xi1> to vector<8x32xi1>
    %41 = arith.select %40, %33, %13 : vector<8x32xi1>, vector<8x32xf32>
    %cst_13 = arith.constant 0.000000e+00 : f32
    %42 = vector.broadcast %cst_13 : f32 to vector<8x32xf32>
    %43 = vector.shape_cast %35 : vector<8x1xi1> to vector<8x1xi1>
    %44 = vector.broadcast %43 : vector<8x1xi1> to vector<8x32xi1>
    %45 = arith.select %44, %33, %42 : vector<8x32xi1>, vector<8x32xf32>
    %46 = vector.extract_strided_slice %10 {offsets = [8, 0], sizes = [8, 128], strides = [1, 1]} : vector<64x128xf32> to vector<8x128xf32>
    %47 = arith.truncf %41 : vector<8x32xf32> to vector<8x32xbf16>
    %cst_14 = arith.constant dense<0.000000e+00> : vector<8x128xf32>
    %48 = tpu.matmul %47, %11, %cst_14 {dimension_numbers = #tpu.dot_dimension_numbers<[1], [0], [0], [1], [0, 0, 1, 1], [], []>} : vector<8x32xbf16>, vector<32x128xbf16>, vector<8x128xf32> -> vector<8x128xf32>
    %49 = arith.addf %46, %48 : vector<8x128xf32>
    %50 = arith.negf %49 : vector<8x128xf32>
    %51 = math.exp %50 : vector<8x128xf32>
    %cst_15 = arith.constant 1.000000e+00 : f32
    %52 = vector.broadcast %cst_15 : f32 to vector<8x128xf32>
    %53 = arith.addf %52, %51 : vector<8x128xf32>
    %54 = arith.divf %52, %53 : vector<8x128xf32>
    %55 = math.tanh %49 : vector<8x128xf32>
    %56 = vector.extract_strided_slice %54 {offsets = [0, 0], sizes = [8, 32], strides = [1, 1]} : vector<8x128xf32> to vector<8x32xf32>
    %57 = vector.extract_strided_slice %54 {offsets = [0, 32], sizes = [8, 32], strides = [1, 1]} : vector<8x128xf32> to vector<8x32xf32>
    %58 = vector.extract_strided_slice %55 {offsets = [0, 64], sizes = [8, 32], strides = [1, 1]} : vector<8x128xf32> to vector<8x32xf32>
    %59 = vector.extract_strided_slice %54 {offsets = [0, 96], sizes = [8, 32], strides = [1, 1]} : vector<8x128xf32> to vector<8x32xf32>
    %60 = arith.mulf %57, %38 : vector<8x32xf32>
    %61 = arith.mulf %56, %58 : vector<8x32xf32>
    %62 = arith.addf %60, %61 : vector<8x32xf32>
    %63 = math.tanh %62 : vector<8x32xf32>
    %64 = arith.mulf %59, %63 : vector<8x32xf32>
    %c1_i32 = arith.constant 1 : i32
    %65 = vector.broadcast %c1_i32 : i32 to vector<8x1xi32>
    %66 = arith.cmpi sgt, %12, %65 : vector<8x1xi32>
    %67 = vector.shape_cast %66 : vector<8x1xi1> to vector<8x1xi1>
    %68 = vector.broadcast %67 : vector<8x1xi1> to vector<8x32xi1>
    %69 = arith.select %68, %62, %38 : vector<8x32xi1>, vector<8x32xf32>
    %70 = vector.shape_cast %66 : vector<8x1xi1> to vector<8x1xi1>
    %71 = vector.broadcast %70 : vector<8x1xi1> to vector<8x32xi1>
    %72 = arith.select %71, %64, %41 : vector<8x32xi1>, vector<8x32xf32>
    %cst_16 = arith.constant 0.000000e+00 : f32
    %73 = vector.broadcast %cst_16 : f32 to vector<8x32xf32>
    %74 = vector.shape_cast %66 : vector<8x1xi1> to vector<8x1xi1>
    %75 = vector.broadcast %74 : vector<8x1xi1> to vector<8x32xi1>
    %76 = arith.select %75, %64, %73 : vector<8x32xi1>, vector<8x32xf32>
    %77 = vector.extract_strided_slice %10 {offsets = [16, 0], sizes = [8, 128], strides = [1, 1]} : vector<64x128xf32> to vector<8x128xf32>
    %78 = arith.truncf %72 : vector<8x32xf32> to vector<8x32xbf16>
    %cst_17 = arith.constant dense<0.000000e+00> : vector<8x128xf32>
    %79 = tpu.matmul %78, %11, %cst_17 {dimension_numbers = #tpu.dot_dimension_numbers<[1], [0], [0], [1], [0, 0, 1, 1], [], []>} : vector<8x32xbf16>, vector<32x128xbf16>, vector<8x128xf32> -> vector<8x128xf32>
    %80 = arith.addf %77, %79 : vector<8x128xf32>
    %81 = arith.negf %80 : vector<8x128xf32>
    %82 = math.exp %81 : vector<8x128xf32>
    %cst_18 = arith.constant 1.000000e+00 : f32
    %83 = vector.broadcast %cst_18 : f32 to vector<8x128xf32>
    %84 = arith.addf %83, %82 : vector<8x128xf32>
    %85 = arith.divf %83, %84 : vector<8x128xf32>
    %86 = math.tanh %80 : vector<8x128xf32>
    %87 = vector.extract_strided_slice %85 {offsets = [0, 0], sizes = [8, 32], strides = [1, 1]} : vector<8x128xf32> to vector<8x32xf32>
    %88 = vector.extract_strided_slice %85 {offsets = [0, 32], sizes = [8, 32], strides = [1, 1]} : vector<8x128xf32> to vector<8x32xf32>
    %89 = vector.extract_strided_slice %86 {offsets = [0, 64], sizes = [8, 32], strides = [1, 1]} : vector<8x128xf32> to vector<8x32xf32>
    %90 = vector.extract_strided_slice %85 {offsets = [0, 96], sizes = [8, 32], strides = [1, 1]} : vector<8x128xf32> to vector<8x32xf32>
    %91 = arith.mulf %88, %69 : vector<8x32xf32>
    %92 = arith.mulf %87, %89 : vector<8x32xf32>
    %93 = arith.addf %91, %92 : vector<8x32xf32>
    %94 = math.tanh %93 : vector<8x32xf32>
    %95 = arith.mulf %90, %94 : vector<8x32xf32>
    %c2_i32 = arith.constant 2 : i32
    %96 = vector.broadcast %c2_i32 : i32 to vector<8x1xi32>
    %97 = arith.cmpi sgt, %12, %96 : vector<8x1xi32>
    %98 = vector.shape_cast %97 : vector<8x1xi1> to vector<8x1xi1>
    %99 = vector.broadcast %98 : vector<8x1xi1> to vector<8x32xi1>
    %100 = arith.select %99, %93, %69 : vector<8x32xi1>, vector<8x32xf32>
    %101 = vector.shape_cast %97 : vector<8x1xi1> to vector<8x1xi1>
    %102 = vector.broadcast %101 : vector<8x1xi1> to vector<8x32xi1>
    %103 = arith.select %102, %95, %72 : vector<8x32xi1>, vector<8x32xf32>
    %cst_19 = arith.constant 0.000000e+00 : f32
    %104 = vector.broadcast %cst_19 : f32 to vector<8x32xf32>
    %105 = vector.shape_cast %97 : vector<8x1xi1> to vector<8x1xi1>
    %106 = vector.broadcast %105 : vector<8x1xi1> to vector<8x32xi1>
    %107 = arith.select %106, %95, %104 : vector<8x32xi1>, vector<8x32xf32>
    %108 = vector.extract_strided_slice %10 {offsets = [24, 0], sizes = [8, 128], strides = [1, 1]} : vector<64x128xf32> to vector<8x128xf32>
    %109 = arith.truncf %103 : vector<8x32xf32> to vector<8x32xbf16>
    %cst_20 = arith.constant dense<0.000000e+00> : vector<8x128xf32>
    %110 = tpu.matmul %109, %11, %cst_20 {dimension_numbers = #tpu.dot_dimension_numbers<[1], [0], [0], [1], [0, 0, 1, 1], [], []>} : vector<8x32xbf16>, vector<32x128xbf16>, vector<8x128xf32> -> vector<8x128xf32>
    %111 = arith.addf %108, %110 : vector<8x128xf32>
    %112 = arith.negf %111 : vector<8x128xf32>
    %113 = math.exp %112 : vector<8x128xf32>
    %cst_21 = arith.constant 1.000000e+00 : f32
    %114 = vector.broadcast %cst_21 : f32 to vector<8x128xf32>
    %115 = arith.addf %114, %113 : vector<8x128xf32>
    %116 = arith.divf %114, %115 : vector<8x128xf32>
    %117 = math.tanh %111 : vector<8x128xf32>
    %118 = vector.extract_strided_slice %116 {offsets = [0, 0], sizes = [8, 32], strides = [1, 1]} : vector<8x128xf32> to vector<8x32xf32>
    %119 = vector.extract_strided_slice %116 {offsets = [0, 32], sizes = [8, 32], strides = [1, 1]} : vector<8x128xf32> to vector<8x32xf32>
    %120 = vector.extract_strided_slice %117 {offsets = [0, 64], sizes = [8, 32], strides = [1, 1]} : vector<8x128xf32> to vector<8x32xf32>
    %121 = vector.extract_strided_slice %116 {offsets = [0, 96], sizes = [8, 32], strides = [1, 1]} : vector<8x128xf32> to vector<8x32xf32>
    %122 = arith.mulf %119, %100 : vector<8x32xf32>
    %123 = arith.mulf %118, %120 : vector<8x32xf32>
    %124 = arith.addf %122, %123 : vector<8x32xf32>
    %125 = math.tanh %124 : vector<8x32xf32>
    %126 = arith.mulf %121, %125 : vector<8x32xf32>
    %c3_i32 = arith.constant 3 : i32
    %127 = vector.broadcast %c3_i32 : i32 to vector<8x1xi32>
    %128 = arith.cmpi sgt, %12, %127 : vector<8x1xi32>
    %129 = vector.shape_cast %128 : vector<8x1xi1> to vector<8x1xi1>
    %130 = vector.broadcast %129 : vector<8x1xi1> to vector<8x32xi1>
    %131 = arith.select %130, %124, %100 : vector<8x32xi1>, vector<8x32xf32>
    %132 = vector.shape_cast %128 : vector<8x1xi1> to vector<8x1xi1>
    %133 = vector.broadcast %132 : vector<8x1xi1> to vector<8x32xi1>
    %134 = arith.select %133, %126, %103 : vector<8x32xi1>, vector<8x32xf32>
    %cst_22 = arith.constant 0.000000e+00 : f32
    %135 = vector.broadcast %cst_22 : f32 to vector<8x32xf32>
    %136 = vector.shape_cast %128 : vector<8x1xi1> to vector<8x1xi1>
    %137 = vector.broadcast %136 : vector<8x1xi1> to vector<8x32xi1>
    %138 = arith.select %137, %126, %135 : vector<8x32xi1>, vector<8x32xf32>
    %139 = tpu.concatenate %45, %76, %107, %138 in 1 : vector<8x32xf32>, vector<8x32xf32>, vector<8x32xf32>, vector<8x32xf32> -> vector<8x128xf32>
    %c0_23 = arith.constant 0 : index
    %c0_24 = arith.constant 0 : index
    %140 = vector.load %arg5[%c0_23, %c0_24] : memref<8x256xf32, #tpu.memory_space<vmem>>, vector<8x128xf32>
    tpu.vector_store %arg5[%c0_23, %c0_24], %139 {strides = array<i32>} : memref<8x256xf32, #tpu.memory_space<vmem>>, vector<8x128xf32>,
    %141 = vector.extract_strided_slice %10 {offsets = [32, 0], sizes = [8, 128], strides = [1, 1]} : vector<64x128xf32> to vector<8x128xf32>
    %142 = arith.truncf %134 : vector<8x32xf32> to vector<8x32xbf16>
    %cst_25 = arith.constant dense<0.000000e+00> : vector<8x128xf32>
    %143 = tpu.matmul %142, %11, %cst_25 {dimension_numbers = #tpu.dot_dimension_numbers<[1], [0], [0], [1], [0, 0, 1, 1], [], []>} : vector<8x32xbf16>, vector<32x128xbf16>, vector<8x128xf32> -> vector<8x128xf32>
    %144 = arith.addf %141, %143 : vector<8x128xf32>
    %145 = arith.negf %144 : vector<8x128xf32>
    %146 = math.exp %145 : vector<8x128xf32>
    %cst_26 = arith.constant 1.000000e+00 : f32
    %147 = vector.broadcast %cst_26 : f32 to vector<8x128xf32>
    %148 = arith.addf %147, %146 : vector<8x128xf32>
    %149 = arith.divf %147, %148 : vector<8x128xf32>
    %150 = math.tanh %144 : vector<8x128xf32>
    %151 = vector.extract_strided_slice %149 {offsets = [0, 0], sizes = [8, 32], strides = [1, 1]} : vector<8x128xf32> to vector<8x32xf32>
    %152 = vector.extract_strided_slice %149 {offsets = [0, 32], sizes = [8, 32], strides = [1, 1]} : vector<8x128xf32> to vector<8x32xf32>
    %153 = vector.extract_strided_slice %150 {offsets = [0, 64], sizes = [8, 32], strides = [1, 1]} : vector<8x128xf32> to vector<8x32xf32>
    %154 = vector.extract_strided_slice %149 {offsets = [0, 96], sizes = [8, 32], strides = [1, 1]} : vector<8x128xf32> to vector<8x32xf32>
    %155 = arith.mulf %152, %131 : vector<8x32xf32>
    %156 = arith.mulf %151, %153 : vector<8x32xf32>
    %157 = arith.addf %155, %156 : vector<8x32xf32>
    %158 = math.tanh %157 : vector<8x32xf32>
    %159 = arith.mulf %154, %158 : vector<8x32xf32>
    %c4_i32 = arith.constant 4 : i32
    %160 = vector.broadcast %c4_i32 : i32 to vector<8x1xi32>
    %161 = arith.cmpi sgt, %12, %160 : vector<8x1xi32>
    %162 = vector.shape_cast %161 : vector<8x1xi1> to vector<8x1xi1>
    %163 = vector.broadcast %162 : vector<8x1xi1> to vector<8x32xi1>
    %164 = arith.select %163, %157, %131 : vector<8x32xi1>, vector<8x32xf32>
    %165 = vector.shape_cast %161 : vector<8x1xi1> to vector<8x1xi1>
    %166 = vector.broadcast %165 : vector<8x1xi1> to vector<8x32xi1>
    %167 = arith.select %166, %159, %134 : vector<8x32xi1>, vector<8x32xf32>
    %cst_27 = arith.constant 0.000000e+00 : f32
    %168 = vector.broadcast %cst_27 : f32 to vector<8x32xf32>
    %169 = vector.shape_cast %161 : vector<8x1xi1> to vector<8x1xi1>
    %170 = vector.broadcast %169 : vector<8x1xi1> to vector<8x32xi1>
    %171 = arith.select %170, %159, %168 : vector<8x32xi1>, vector<8x32xf32>
    %172 = vector.extract_strided_slice %10 {offsets = [40, 0], sizes = [8, 128], strides = [1, 1]} : vector<64x128xf32> to vector<8x128xf32>
    %173 = arith.truncf %167 : vector<8x32xf32> to vector<8x32xbf16>
    %cst_28 = arith.constant dense<0.000000e+00> : vector<8x128xf32>
    %174 = tpu.matmul %173, %11, %cst_28 {dimension_numbers = #tpu.dot_dimension_numbers<[1], [0], [0], [1], [0, 0, 1, 1], [], []>} : vector<8x32xbf16>, vector<32x128xbf16>, vector<8x128xf32> -> vector<8x128xf32>
    %175 = arith.addf %172, %174 : vector<8x128xf32>
    %176 = arith.negf %175 : vector<8x128xf32>
    %177 = math.exp %176 : vector<8x128xf32>
    %cst_29 = arith.constant 1.000000e+00 : f32
    %178 = vector.broadcast %cst_29 : f32 to vector<8x128xf32>
    %179 = arith.addf %178, %177 : vector<8x128xf32>
    %180 = arith.divf %178, %179 : vector<8x128xf32>
    %181 = math.tanh %175 : vector<8x128xf32>
    %182 = vector.extract_strided_slice %180 {offsets = [0, 0], sizes = [8, 32], strides = [1, 1]} : vector<8x128xf32> to vector<8x32xf32>
    %183 = vector.extract_strided_slice %180 {offsets = [0, 32], sizes = [8, 32], strides = [1, 1]} : vector<8x128xf32> to vector<8x32xf32>
    %184 = vector.extract_strided_slice %181 {offsets = [0, 64], sizes = [8, 32], strides = [1, 1]} : vector<8x128xf32> to vector<8x32xf32>
    %185 = vector.extract_strided_slice %180 {offsets = [0, 96], sizes = [8, 32], strides = [1, 1]} : vector<8x128xf32> to vector<8x32xf32>
    %186 = arith.mulf %183, %164 : vector<8x32xf32>
    %187 = arith.mulf %182, %184 : vector<8x32xf32>
    %188 = arith.addf %186, %187 : vector<8x32xf32>
    %189 = math.tanh %188 : vector<8x32xf32>
    %190 = arith.mulf %185, %189 : vector<8x32xf32>
    %c5_i32 = arith.constant 5 : i32
    %191 = vector.broadcast %c5_i32 : i32 to vector<8x1xi32>
    %192 = arith.cmpi sgt, %12, %191 : vector<8x1xi32>
    %193 = vector.shape_cast %192 : vector<8x1xi1> to vector<8x1xi1>
    %194 = vector.broadcast %193 : vector<8x1xi1> to vector<8x32xi1>
    %195 = arith.select %194, %188, %164 : vector<8x32xi1>, vector<8x32xf32>
    %196 = vector.shape_cast %192 : vector<8x1xi1> to vector<8x1xi1>
    %197 = vector.broadcast %196 : vector<8x1xi1> to vector<8x32xi1>
    %198 = arith.select %197, %190, %167 : vector<8x32xi1>, vector<8x32xf32>
    %cst_30 = arith.constant 0.000000e+00 : f32
    %199 = vector.broadcast %cst_30 : f32 to vector<8x32xf32>
    %200 = vector.shape_cast %192 : vector<8x1xi1> to vector<8x1xi1>
    %201 = vector.broadcast %200 : vector<8x1xi1> to vector<8x32xi1>
    %202 = arith.select %201, %190, %199 : vector<8x32xi1>, vector<8x32xf32>
    %203 = vector.extract_strided_slice %10 {offsets = [48, 0], sizes = [8, 128], strides = [1, 1]} : vector<64x128xf32> to vector<8x128xf32>
    %204 = arith.truncf %198 : vector<8x32xf32> to vector<8x32xbf16>
    %cst_31 = arith.constant dense<0.000000e+00> : vector<8x128xf32>
    %205 = tpu.matmul %204, %11, %cst_31 {dimension_numbers = #tpu.dot_dimension_numbers<[1], [0], [0], [1], [0, 0, 1, 1], [], []>} : vector<8x32xbf16>, vector<32x128xbf16>, vector<8x128xf32> -> vector<8x128xf32>
    %206 = arith.addf %203, %205 : vector<8x128xf32>
    %207 = arith.negf %206 : vector<8x128xf32>
    %208 = math.exp %207 : vector<8x128xf32>
    %cst_32 = arith.constant 1.000000e+00 : f32
    %209 = vector.broadcast %cst_32 : f32 to vector<8x128xf32>
    %210 = arith.addf %209, %208 : vector<8x128xf32>
    %211 = arith.divf %209, %210 : vector<8x128xf32>
    %212 = math.tanh %206 : vector<8x128xf32>
    %213 = vector.extract_strided_slice %211 {offsets = [0, 0], sizes = [8, 32], strides = [1, 1]} : vector<8x128xf32> to vector<8x32xf32>
    %214 = vector.extract_strided_slice %211 {offsets = [0, 32], sizes = [8, 32], strides = [1, 1]} : vector<8x128xf32> to vector<8x32xf32>
    %215 = vector.extract_strided_slice %212 {offsets = [0, 64], sizes = [8, 32], strides = [1, 1]} : vector<8x128xf32> to vector<8x32xf32>
    %216 = vector.extract_strided_slice %211 {offsets = [0, 96], sizes = [8, 32], strides = [1, 1]} : vector<8x128xf32> to vector<8x32xf32>
    %217 = arith.mulf %214, %195 : vector<8x32xf32>
    %218 = arith.mulf %213, %215 : vector<8x32xf32>
    %219 = arith.addf %217, %218 : vector<8x32xf32>
    %220 = math.tanh %219 : vector<8x32xf32>
    %221 = arith.mulf %216, %220 : vector<8x32xf32>
    %c6_i32 = arith.constant 6 : i32
    %222 = vector.broadcast %c6_i32 : i32 to vector<8x1xi32>
    %223 = arith.cmpi sgt, %12, %222 : vector<8x1xi32>
    %224 = vector.shape_cast %223 : vector<8x1xi1> to vector<8x1xi1>
    %225 = vector.broadcast %224 : vector<8x1xi1> to vector<8x32xi1>
    %226 = arith.select %225, %219, %195 : vector<8x32xi1>, vector<8x32xf32>
    %227 = vector.shape_cast %223 : vector<8x1xi1> to vector<8x1xi1>
    %228 = vector.broadcast %227 : vector<8x1xi1> to vector<8x32xi1>
    %229 = arith.select %228, %221, %198 : vector<8x32xi1>, vector<8x32xf32>
    %cst_33 = arith.constant 0.000000e+00 : f32
    %230 = vector.broadcast %cst_33 : f32 to vector<8x32xf32>
    %231 = vector.shape_cast %223 : vector<8x1xi1> to vector<8x1xi1>
    %232 = vector.broadcast %231 : vector<8x1xi1> to vector<8x32xi1>
    %233 = arith.select %232, %221, %230 : vector<8x32xi1>, vector<8x32xf32>
    %234 = vector.extract_strided_slice %10 {offsets = [56, 0], sizes = [8, 128], strides = [1, 1]} : vector<64x128xf32> to vector<8x128xf32>
    %235 = arith.truncf %229 : vector<8x32xf32> to vector<8x32xbf16>
    %cst_34 = arith.constant dense<0.000000e+00> : vector<8x128xf32>
    %236 = tpu.matmul %235, %11, %cst_34 {dimension_numbers = #tpu.dot_dimension_numbers<[1], [0], [0], [1], [0, 0, 1, 1], [], []>} : vector<8x32xbf16>, vector<32x128xbf16>, vector<8x128xf32> -> vector<8x128xf32>
    %237 = arith.addf %234, %236 : vector<8x128xf32>
    %238 = arith.negf %237 : vector<8x128xf32>
    %239 = math.exp %238 : vector<8x128xf32>
    %cst_35 = arith.constant 1.000000e+00 : f32
    %240 = vector.broadcast %cst_35 : f32 to vector<8x128xf32>
    %241 = arith.addf %240, %239 : vector<8x128xf32>
    %242 = arith.divf %240, %241 : vector<8x128xf32>
    %243 = math.tanh %237 : vector<8x128xf32>
    %244 = vector.extract_strided_slice %242 {offsets = [0, 0], sizes = [8, 32], strides = [1, 1]} : vector<8x128xf32> to vector<8x32xf32>
    %245 = vector.extract_strided_slice %242 {offsets = [0, 32], sizes = [8, 32], strides = [1, 1]} : vector<8x128xf32> to vector<8x32xf32>
    %246 = vector.extract_strided_slice %243 {offsets = [0, 64], sizes = [8, 32], strides = [1, 1]} : vector<8x128xf32> to vector<8x32xf32>
    %247 = vector.extract_strided_slice %242 {offsets = [0, 96], sizes = [8, 32], strides = [1, 1]} : vector<8x128xf32> to vector<8x32xf32>
    %248 = arith.mulf %245, %226 : vector<8x32xf32>
    %249 = arith.mulf %244, %246 : vector<8x32xf32>
    %250 = arith.addf %248, %249 : vector<8x32xf32>
    %251 = math.tanh %250 : vector<8x32xf32>
    %252 = arith.mulf %247, %251 : vector<8x32xf32>
    %c7_i32 = arith.constant 7 : i32
    %253 = vector.broadcast %c7_i32 : i32 to vector<8x1xi32>
    %254 = arith.cmpi sgt, %12, %253 : vector<8x1xi32>
    %255 = vector.shape_cast %254 : vector<8x1xi1> to vector<8x1xi1>
    %256 = vector.broadcast %255 : vector<8x1xi1> to vector<8x32xi1>
    %257 = arith.select %256, %250, %226 : vector<8x32xi1>, vector<8x32xf32>
    %258 = vector.shape_cast %254 : vector<8x1xi1> to vector<8x1xi1>
    %259 = vector.broadcast %258 : vector<8x1xi1> to vector<8x32xi1>
    %260 = arith.select %259, %252, %229 : vector<8x32xi1>, vector<8x32xf32>
    %cst_36 = arith.constant 0.000000e+00 : f32
    %261 = vector.broadcast %cst_36 : f32 to vector<8x32xf32>
    %262 = vector.shape_cast %254 : vector<8x1xi1> to vector<8x1xi1>
    %263 = vector.broadcast %262 : vector<8x1xi1> to vector<8x32xi1>
    %264 = arith.select %263, %252, %261 : vector<8x32xi1>, vector<8x32xf32>
    %265 = tpu.concatenate %171, %202, %233, %264 in 1 : vector<8x32xf32>, vector<8x32xf32>, vector<8x32xf32>, vector<8x32xf32> -> vector<8x128xf32>
    %c0_37 = arith.constant 0 : index
    %c128 = arith.constant 128 : index
    %266 = vector.load %arg5[%c0_37, %c128] : memref<8x256xf32, #tpu.memory_space<vmem>>, vector<8x128xf32>
    tpu.vector_store %arg5[%c0_37, %c128], %265 {strides = array<i32>} : memref<8x256xf32, #tpu.memory_space<vmem>>, vector<8x128xf32>,
    %cst_38 = arith.constant 0.000000e+00 : f32
    %267 = vector.broadcast %cst_38 : f32 to vector<8x64xf32>
    %268 = tpu.concatenate %260, %257, %267 in 1 : vector<8x32xf32>, vector<8x32xf32>, vector<8x64xf32> -> vector<8x128xf32>
    %c0_39 = arith.constant 0 : index
    %c0_40 = arith.constant 0 : index
    %269 = vector.load %arg6[%c0_39, %c0_40] : memref<8x128xf32, #tpu.memory_space<vmem>>, vector<8x128xf32>
    tpu.vector_store %arg6[%c0_39, %c0_40], %268 {strides = array<i32>} : memref<8x128xf32, #tpu.memory_space<vmem>>, vector<8x128xf32>,
    return
  }
}

</mosaic_0001>

<bundles_post_ra>
// kernel: tpu_custom_call.1
= control target key start
LH: loop header
LB: loop body
LE: loop exit
PB: predicated region body
PF: predicated region fallthrough
CT: control target
= control target key end

     0   :  { %12 = vsyncpa [#allocation3], 0  ;;  %v947_v2 = vmov 0   ;;  %s1259_s0 = inlined_call_operand.vmem [shape: s32[64,1], index: 0, kind: input, shape index: {}]   ;;  %s1260_s1 = inlined_call_operand.vmem [shape: s32[8,1], index: 1, kind: input, shape index: {}]   ;;  %s1261_s2 = inlined_call_operand.vmem [shape: f32[16,128], index: 2, kind: input, shape index: {}]   ;;  %s1262_s3 = inlined_call_operand.vmem [shape: bf16[32,128], index: 3, kind: input, shape index: {}]   ;;  %s1263_s4 = inlined_call_operand.vmem [shape: f32[1,128], index: 4, kind: input, shape index: {}]   ;;  %s1264_s5 = inlined_call_operand.hbm [shape: f32[8,256], index: 5, kind: output, shape index: {0}]   ;;  %s1265_s6 = inlined_call_operand.hbm [shape: f32[8,128], index: 6, kind: output, shape index: {1}]  }
   0x1   :  { %v25_v0 = vld [vmem:[%s1259_s0] sm:$0xff]  ;;  %v995_v1 = vld [vmem:[%s1262_s3 + $0x8] sm:$0xff]  ;;  %827 = vset.pattern.permute.xlu0 %v947_v2  ;;  %828 = vset.pattern.permute.xlu2 %v947_v2 }
   0x2   :  { %v84_v3 = vld [vmem:[%s1261_s2 + $0x8] sm:$0xff] }
   0x3   :  { %13 = vsyncpa [#allocation5], 0  ;;  %36 = vperm.xlu0 %827, %v25_v0   ;;  %182 = vmatpush.bf16.msra.mxu1 %v995_v1  ;;  %v1006_v4 = vld [vmem:[%s1262_s3] sm:$0xff]  ;;  %v33_v6 = vlaneseq  ;;  %vm89_vm0 = vcmask 130048   ;;  %v948_v9 = vmov 0.0   ;;  %s949_s7 = smov 64  }
   0x4   :  { %128 = vmatpush.msra.mxu0 %v84_v3  ;;  %248 = vmatpush.bf16.msra.mxu2 %v995_v1  ;;  %v83_v5 = vld [vmem:[%s1261_s2] sm:$0xff]  ;;  %v26_v18 = vld [vmem:[%s1259_s0 + $0x8] sm:$0xff]  ;;  %vm172_vm9 = vcmask 261120   ;;  %s952_s23 = smov [#allocation2]   ;;  %s752_s27 = sshll.u32 %s1264_s5, 4  ;;  %s753_s27 = int_to_ptr.hbm [resolvable:$true] %s752_s27 }
   0x5   :  { %829 = vset.pattern.permute.xlu1 %v947_v2  ;;  %818 = vmatpush.msra.mxu3 %v84_v3  ;;  %v1024_v7 = vand.u32 127, %v33_v6  ;;  %v1032_v13 = vld [vmem:[%s1263_s4] ss:$0 sm:$0xff]  ;;  %s750_s24 = sshll.u32 %s952_s23, 4  ;;  %s953_s28 = smov [#allocation4]   ;;  %s751_s24 = int_to_ptr.vmem [resolvable:$true] %s750_s24 }
   0x6   :  { %129 = vmatpush.msra.mxu0 %v83_v5  ;;  %v1042_v23 = vld [vmem:[%s1260_s1] sm:$0xff]  ;;  %s950_s1 = smov 32   ;;  %s761_s3 = sshll.u32 %s953_s28, 4  ;;  %s762_s3 = int_to_ptr.vmem [resolvable:$true] %s761_s3 }
   0x7   :  { %183 = vmatpush.bf16.msra.mxu1 %v1006_v4  ;;  %819 = vmatpush.msra.mxu3 %v83_v5  ;;  %vm227_vm2 = vcmp.gt.s32.totalorder %v1042_v23, 0  ;;  %vm293_vm10 = vcmp.gt.s32.totalorder %v1042_v23, 1  ;;  %s763_s5 = sshll.u32 %s1265_s6, 4  ;;  %s764_s5 = int_to_ptr.hbm [resolvable:$true] %s763_s5 }
   0x8   :  { %249 = vmatpush.bf16.msra.mxu2 %v1006_v4  ;;  %v228_v25 = vsel %vm227_vm2, 1, %v947_v2  ;;  %v294_v54 = vsel %vm293_vm10, 1, %v947_v2 }
   0x9   :  { %315 = vmatpush.bf16.msrb.mxu3 %v995_v1  ;;  %230 = vperm.xlu2 %828, %v228_v25  }
   0xa   :  { %184 = vmatmul.bf16.vlgmr.msra.gmra.mxu1 %v947_v2 }
   0xb   :  { %382 = vmatpush.bf16.msrb.mxu1 %v995_v1 }
   0xc   :  { %467 = vmatpush.bf16.msrb.mxu2 %v995_v1 }
   0xd   :  { %316 = vmatpush.bf16.msrb.mxu3 %v1006_v4 }
   0xf   :  { %383 = vmatpush.bf16.msrb.mxu1 %v1006_v4 }
  0x10   :  { %468 = vmatpush.bf16.msrb.mxu2 %v1006_v4 }
  0x13   :  { %601 = vmatpush.bf16.msra.mxu1 %v995_v1 }
  0x17   :  { %602 = vmatpush.bf16.msra.mxu1 %v1006_v4 }
  0x63   :  { %v231_v42 = vpop.permute.xlu2 %230 }
  0x64   :  { %vm232_vm8 = vcmp.eq.s32.totalorder %v231_v42, 1 }
  0x75   :  { %v37_v8 = vpop.permute.xlu0 %36 }
  0x76   :  { %vm59_vm1 = vcmp.eq.s32.totalorder %v37_v8, %v1024_v7 }
  0x77   :  { %v777_v10 = vsel %vm59_vm1, 1.0, %v948_v9 }
  0x78   :  { %785 = vmatmul.msk.f32.vlgmr.msra.gmra.mxu0 %vm89_vm0, %v777_v10 }
  0x87   :  { %v185_v11 = vpop.f32.mrf.mxu1 }
  0x8f   :  { %v187_v12 = vpop.f32.mrf.mxu1 }
  0x90   :  { %v27_v12 = vld [vmem:[%s1259_s0 + $0x10] sm:$0xff] }
  0xf5   :  { %v131_v14 = vpop.f32.mrf.mxu0 }
  0xf6   :  { %v132_v15 = vadd.f32 %v1032_v13, %v131_v14 }
  0xf8   :  { %v189_v16 = vadd.f32 %v185_v11, %v132_v15  ;;  %v32_v11 = vld [vmem:[%s1259_s0 + $0x38] sm:$0xff] }
  0xfa   :  { %831 = vtanh.f32 %v189_v16  ;;  %v801_v19 = vmul.f32 -1.442695, %v189_v16 }
  0xfc   :  { %833 = vpow2.f32 %v801_v19 }
 0x100   :  { %v832_v17 = vpop.eup %831 }
 0x101   :  { %212 = vrot.lane.b32.xlu0 %v832_v17, %s949_s7 }
 0x102   :  { %v834_v20 = vpop.eup %833 }
 0x103   :  { %v193_v21 = vadd.f32 1.0, %v834_v20 }
 0x105   :  { %835 = vrcp.f32 %v193_v21  ;;  %v205_v29 = vand.u32 2147483648, %v193_v21  ;;  %vm199_vm4 = vweird.f32 %v193_v21  ;;  %v203_v30 = vand.u32 2147483647, %v193_v21 }
 0x107   :  { %v206_v32 = vor.u32 1.1754944e-38, %v205_v29  ;;  %vm204_vm6 = vcmp.eq.f32.partialorder %v203_v30, 8.507059e+37 }
 0x109   :  { %39 = vperm.xlu0 %827, %v26_v18  }
 0x10b   :  { %v836_v22 = vpop.eup %835 }
 0x10c   :  { %v195_v24 = vmul.f32 %v836_v22, %v193_v21  ;;  %vm200_vm3 = vweird.f32 %v836_v22 }
 0x10d   :  { %vm201_vm5 = vmor %vm199_vm4, %vm200_vm3  ;;  %vm360_vm3 = vcmp.gt.s32.totalorder %v1042_v23, 2 }
 0x10e   :  { %v196_v26 = vsub.f32 1.0, %v195_v24 }
 0x110   :  { %v197_v27 = vmul.f32 %v836_v22, %v196_v26 }
 0x112   :  { %v198_v28 = vadd.f32 %v836_v22, %v197_v27 }
 0x114   :  { %v202_v31 = vsel %vm201_vm5, %v836_v22, %v198_v28 }
 0x115   :  { %v207_v34 = vsel %vm204_vm6, %v206_v32, %v202_v31 }
 0x116   :  { %v210_v38 = vmul.f32 0.0, %v207_v34 }
 0x173   :  { %v213_v33 = vpop.permute.xlu0 %212 }
 0x174   :  { %v215_v35 = vmul.f32 %v213_v33, %v207_v34 }
 0x176   :  { %217 = vrot.lane.b32.xlu1 %v215_v35, %s950_s1  ;;  %v361_v35 = vsel %vm360_vm3, 1, %v947_v2 }
 0x17b   :  { %v40_v36 = vpop.permute.xlu0 %39 }
 0x17c   :  { %vm60_vm7 = vcmp.eq.s32.totalorder %v40_v36, %v1024_v7 }
 0x17d   :  { %v778_v37 = vsel %vm60_vm7, 1.0, %v948_v9 }
 0x17e   :  { %786 = vmatmul.msk.f32.gmra.mxu0 %vm89_vm0, %v778_v37 }
 0x1e8   :  { %v218_v39 = vpop.permute.xlu1 %217 }
 0x1e9   :  { %v220_v40 = vadd.f32 %v218_v39, %v210_v38 }
 0x1eb   :  { %837 = vtanh.f32 %v220_v40  ;;  %v1072_v14 = vsel %vm232_vm8, %v220_v40, 0.0 }
 0x1f1   :  { %v838_v41 = vpop.eup %837 }
 0x1f2   :  { %223 = vrot.lane.b32.xlu1 %v838_v41, %s949_s7 }
 0x1fb   :  { %v134_v48 = vpop.f32.mrf.mxu0 }
 0x1fc   :  { %v135_v49 = vadd.f32 %v1032_v13, %v134_v48 }
 0x264   :  { %v224_v43 = vpop.permute.xlu1 %223 }
 0x265   :  { %v226_v44 = vmul.f32 %v224_v43, %v207_v34 }
 0x267   :  { %v1052_v45 = vsel %vm232_vm8, %v226_v44, 0.0 }
 0x268   :  { %v235_v46 = vpack.c.bf16 %v1052_v45, %v1052_v45 }
 0x26a   :  { %237 = vrot.lane.b32.xlu2 %v235_v46, %s950_s1 }
 0x2c4   :  { %v238_v47 = vpop.permute.xlu2 %237 }
 0x2c5   :  { %802 = vmatmul.msk.bf16.vlgmr.msra.gmra.mxu2 %vm172_vm9, %v238_v47 }
 0x2c6   :  { %668 = vmatpush.bf16.msra.mxu2 %v995_v1 }
 0x2ca   :  { %669 = vmatpush.bf16.msra.mxu2 %v1006_v4 }
 0x348   :  { %v251_v50 = vpop.f32.mrf.mxu2 }
 0x349   :  { %v255_v51 = vadd.f32 %v251_v50, %v135_v49 }
 0x34b   :  { %839 = vtanh.f32 %v255_v51  ;;  %v803_v55 = vmul.f32 -1.442695, %v255_v51 }
 0x34d   :  { %841 = vpow2.f32 %v803_v55 }
 0x350   :  { %v253_v52 = vpop.f32.mrf.mxu2 }
 0x351   :  { %v840_v53 = vpop.eup %839  ;;  %v28_v52 = vld [vmem:[%s1259_s0 + $0x18] sm:$0xff] }
 0x352   :  { %278 = vrot.lane.b32.xlu1 %v840_v53, %s949_s7 }
 0x353   :  { %v842_v56 = vpop.eup %841 }
 0x354   :  { %v259_v57 = vadd.f32 1.0, %v842_v56 }
 0x356   :  { %843 = vrcp.f32 %v259_v57  ;;  %v271_v63 = vand.u32 2147483648, %v259_v57  ;;  %vm265_vm12 = vweird.f32 %v259_v57  ;;  %v269_v0 = vand.u32 2147483647, %v259_v57 }
 0x358   :  { %v272_v5 = vor.u32 1.1754944e-38, %v271_v63  ;;  %vm270_vm14 = vcmp.eq.f32.partialorder %v269_v0, 8.507059e+37 }
 0x35a   :  { %296 = vperm.xlu1 %829, %v294_v54  }
 0x35c   :  { %v844_v58 = vpop.eup %843 }
 0x35d   :  { %v261_v59 = vmul.f32 %v844_v58, %v259_v57  ;;  %vm266_vm11 = vweird.f32 %v844_v58 }
 0x35e   :  { %vm267_vm13 = vmor %vm265_vm12, %vm266_vm11  ;;  %vm427_vm11 = vcmp.gt.s32.totalorder %v1042_v23, 3 }
 0x35f   :  { %v262_v60 = vsub.f32 1.0, %v261_v59 }
 0x361   :  { %v263_v61 = vmul.f32 %v844_v58, %v262_v60 }
 0x362   :  { %42 = vperm.xlu1 %829, %v27_v12  }
 0x363   :  { %v264_v62 = vadd.f32 %v844_v58, %v263_v61 }
 0x365   :  { %v268_v3 = vsel %vm267_vm13, %v844_v58, %v264_v62 }
 0x366   :  { %v273_v8 = vsel %vm270_vm14, %v272_v5, %v268_v3 }
 0x367   :  { %v276_v15 = vmul.f32 %v273_v8, %v1072_v14 }
 0x3c4   :  { %v279_v6 = vpop.permute.xlu1 %278 }
 0x3c5   :  { %v281_v10 = vmul.f32 %v279_v6, %v273_v8 }
 0x3c7   :  { %283 = vrot.lane.b32.xlu2 %v281_v10, %s950_s1 }
 0x3cc   :  { %v1081_v21 = vpop.permute.xlu1 %296 }
 0x3cd   :  { %vm298_vm2 = vcmp.eq.s32.totalorder %v1081_v21, 1 }
 0x3cf   :  { %57 = vperm.xlu2 %828, %v32_v11  }
 0x3d4   :  { %v43_v22 = vpop.permute.xlu1 %42 }
 0x3d5   :  { %vm61_vm1 = vcmp.eq.s32.totalorder %v43_v22, %v1024_v7 }
 0x3d6   :  { %v779_v24 = vsel %vm61_vm1, 1.0, %v948_v9 }
 0x3d7   :  { %787 = vmatmul.msk.f32.gmra.mxu0 %vm89_vm0, %v779_v24 }
 0x421   :  { %v284_v16 = vpop.permute.xlu2 %283 }
 0x422   :  { %v286_v17 = vadd.f32 %v284_v16, %v276_v15 }
 0x424   :  { %845 = vtanh.f32 %v286_v17  ;;  %v299_v53 = vsel %vm298_vm2, %v286_v17, %v1072_v14  ;;  %v428_v14 = vsel %vm427_vm11, 1, %v947_v2 }
 0x429   :  { %v58_v18 = vpop.permute.xlu2 %57 }
 0x42a   :  { %v846_v19 = vpop.eup %845  ;;  %vm66_vm15 = vcmp.eq.s32.totalorder %v58_v18, %v1024_v7 }
 0x42b   :  { %v784_v20 = vsel %vm66_vm15, 1.0, %v948_v9  ;;  %289 = vrot.lane.b32.xlu0 %v846_v19, %s949_s7 }
 0x42c   :  { %792 = vmatmul.msk.f32.vlgmr.msra.gmra.mxu3 %vm89_vm0, %v784_v20 }
 0x42d   :  { %534 = vmatpush.bf16.msra.mxu3 %v995_v1 }
 0x431   :  { %535 = vmatpush.bf16.msra.mxu3 %v1006_v4 }
 0x454   :  { %v137_v29 = vpop.f32.mrf.mxu0 }
 0x455   :  { %v138_v30 = vadd.f32 %v1032_v13, %v137_v29 }
 0x49d   :  { %v290_v25 = vpop.permute.xlu0 %289 }
 0x49e   :  { %v1086_v26 = vmul.f32 %v290_v25, %v273_v8 }
 0x4a0   :  { %v300_v1 = vsel %vm298_vm2, %v1086_v26, %v1052_v45 }
 0x4a1   :  { %v302_v4 = vpack.c.bf16 %v300_v1, %v300_v1 }
 0x4a3   :  { %304 = vrot.lane.b32.xlu0 %v302_v4, %s950_s1 }
 0x4af   :  { %v1095_v28 = vpop.f32.mrf.mxu3 }
 0x515   :  { %v305_v27 = vpop.permute.xlu0 %304 }
 0x516   :  { %804 = vmatmul.msk.bf16.vlgmr.msrb.gmra.mxu3 %vm172_vm9, %v305_v27 }
 0x599   :  { %v318_v31 = vpop.f32.mrf.mxu3 }
 0x59a   :  { %v322_v32 = vadd.f32 %v318_v31, %v138_v30 }
 0x59c   :  { %847 = vtanh.f32 %v322_v32  ;;  %v805_v36 = vmul.f32 -1.442695, %v322_v32 }
 0x59e   :  { %849 = vpow2.f32 %v805_v36 }
 0x5a1   :  { %v320_v33 = vpop.f32.mrf.mxu3 }
 0x5a2   :  { %v848_v34 = vpop.eup %847 }
 0x5a3   :  { %345 = vrot.lane.b32.xlu2 %v848_v34, %s949_s7 }
 0x5a4   :  { %v850_v37 = vpop.eup %849 }
 0x5a5   :  { %v326_v38 = vadd.f32 1.0, %v850_v37  ;;  %v29_v37 = vld [vmem:[%s1259_s0 + $0x20] sm:$0xff] }
 0x5a7   :  { %851 = vrcp.f32 %v326_v38  ;;  %v338_v44 = vand.u32 2147483648, %v326_v38  ;;  %vm332_vm5 = vweird.f32 %v326_v38  ;;  %v336_v46 = vand.u32 2147483647, %v326_v38 }
 0x5a9   :  { %v339_v48 = vor.u32 1.1754944e-38, %v338_v44  ;;  %vm337_vm7 = vcmp.eq.f32.partialorder %v336_v46, 8.507059e+37 }
 0x5ab   :  { %363 = vperm.xlu2 %828, %v361_v35  }
 0x5ad   :  { %v852_v39 = vpop.eup %851 }
 0x5ae   :  { %v328_v40 = vmul.f32 %v852_v39, %v326_v38  ;;  %vm333_vm4 = vweird.f32 %v852_v39 }
 0x5af   :  { %vm334_vm6 = vmor %vm332_vm5, %vm333_vm4  ;;  %vm512_vm4 = vcmp.gt.s32.totalorder %v1042_v23, 4 }
 0x5b0   :  { %v329_v41 = vsub.f32 1.0, %v328_v40 }
 0x5b2   :  { %v330_v42 = vmul.f32 %v852_v39, %v329_v41 }
 0x5b4   :  { %v331_v43 = vadd.f32 %v852_v39, %v330_v42 }
 0x5b6   :  { %v335_v47 = vsel %vm334_vm6, %v852_v39, %v331_v43 }
 0x5b7   :  { %v340_v50 = vsel %vm337_vm7, %v339_v48, %v335_v47 }
 0x5b8   :  { %v343_v54 = vmul.f32 %v340_v50, %v299_v53 }
 0x5fd   :  { %v346_v49 = vpop.permute.xlu2 %345 }
 0x5fe   :  { %v348_v51 = vmul.f32 %v346_v49, %v340_v50 }
 0x600   :  { %350 = vrot.lane.b32.xlu0 %v348_v51, %s950_s1 }
 0x605   :  { %v1112_v60 = vpop.permute.xlu2 %363 }
 0x606   :  { %vm365_vm10 = vcmp.eq.s32.totalorder %v1112_v60, 1 }
 0x608   :  { %45 = vperm.xlu0 %827, %v28_v52  }
 0x672   :  { %v351_v55 = vpop.permute.xlu0 %350 }
 0x673   :  { %v353_v56 = vadd.f32 %v351_v55, %v343_v54 }
 0x675   :  { %853 = vtanh.f32 %v353_v56  ;;  %v366_v32 = vsel %vm365_vm10, %v353_v56, %v299_v53  ;;  %v513_v53 = vsel %vm512_vm4, 1, %v947_v2 }
 0x67a   :  { %v46_v57 = vpop.permute.xlu0 %45 }
 0x67b   :  { %v854_v58 = vpop.eup %853  ;;  %vm62_vm8 = vcmp.eq.s32.totalorder %v46_v57, %v1024_v7 }
 0x67c   :  { %v780_v59 = vsel %vm62_vm8, 1.0, %v948_v9  ;;  %356 = vrot.lane.b32.xlu1 %v854_v58, %s949_s7 }
 0x67d   :  { %788 = vmatmul.msk.f32.gmra.mxu0 %vm89_vm0, %v780_v59 }
 0x6ee   :  { %v357_v61 = vpop.permute.xlu1 %356 }
 0x6ef   :  { %v1114_v62 = vmul.f32 %v357_v61, %v340_v50 }
 0x6f1   :  { %v367_v63 = vsel %vm365_vm10, %v1114_v62, %v300_v1 }
 0x6f2   :  { %v369_v0 = vpack.c.bf16 %v367_v63, %v367_v63 }
 0x6f4   :  { %371 = vrot.lane.b32.xlu1 %v369_v0, %s950_s1 }
 0x6fa   :  { %v140_v5 = vpop.f32.mrf.mxu0 }
 0x6fb   :  { %v141_v6 = vadd.f32 %v1032_v13, %v140_v5 }
 0x766   :  { %v372_v3 = vpop.permute.xlu1 %371 }
 0x767   :  { %806 = vmatmul.msk.bf16.vlgmr.msrb.gmra.mxu1 %vm172_vm9, %v372_v3 }
 0x7e4   :  { %v385_v8 = vpop.f32.mrf.mxu1 }
 0x7e5   :  { %v389_v10 = vadd.f32 %v385_v8, %v141_v6 }
 0x7e7   :  { %855 = vtanh.f32 %v389_v10  ;;  %v807_v15 = vmul.f32 -1.442695, %v389_v10 }
 0x7e9   :  { %857 = vpow2.f32 %v807_v15 }
 0x7ec   :  { %v387_v11 = vpop.f32.mrf.mxu1 }
 0x7ed   :  { %v856_v12 = vpop.eup %855 }
 0x7ee   :  { %412 = vrot.lane.b32.xlu2 %v856_v12, %s949_s7 }
 0x7ef   :  { %v858_v16 = vpop.eup %857 }
 0x7f0   :  { %v393_v17 = vadd.f32 1.0, %v858_v16 }
 0x7f2   :  { %859 = vrcp.f32 %v393_v17  ;;  %v405_v25 = vand.u32 2147483648, %v393_v17  ;;  %vm399_vm13 = vweird.f32 %v393_v17  ;;  %v403_v1 = vand.u32 2147483647, %v393_v17 }
 0x7f4   :  { %v406_v27 = vor.u32 1.1754944e-38, %v405_v25  ;;  %vm404_vm15 = vcmp.eq.f32.partialorder %v403_v1, 8.507059e+37 }
 0x7f6   :  { %430 = vperm.xlu2 %828, %v428_v14  }
 0x7f8   :  { %v860_v18 = vpop.eup %859 }
 0x7f9   :  { %v395_v19 = vmul.f32 %v860_v18, %v393_v17  ;;  %vm400_vm12 = vweird.f32 %v860_v18 }
 0x7fa   :  { %vm401_vm14 = vmor %vm399_vm13, %vm400_vm12  ;;  %vm579_vm13 = vcmp.gt.s32.totalorder %v1042_v23, 5 }
 0x7fb   :  { %v396_v20 = vsub.f32 1.0, %v395_v19 }
 0x7fd   :  { %v397_v22 = vmul.f32 %v860_v18, %v396_v20 }
 0x7ff   :  { %v398_v24 = vadd.f32 %v860_v18, %v397_v22 }
 0x801   :  { %v402_v4 = vsel %vm401_vm14, %v860_v18, %v398_v24  ;;  %v30_v18 = vld [vmem:[%s1259_s0 + $0x28] sm:$0xff] }
 0x802   :  { %v407_v30 = vsel %vm404_vm15, %v406_v27, %v402_v4 }
 0x803   :  { %v410_v33 = vmul.f32 %v407_v30, %v366_v32 }
 0x848   :  { %v413_v29 = vpop.permute.xlu2 %412 }
 0x849   :  { %v415_v31 = vmul.f32 %v413_v29, %v407_v30 }
 0x84b   :  { %417 = vrot.lane.b32.xlu0 %v415_v31, %s950_s1 }
 0x850   :  { %v1133_v38 = vpop.permute.xlu2 %430 }
 0x851   :  { %vm432_vm1 = vcmp.eq.s32.totalorder %v1133_v38, 1 }
 0x8bd   :  { %v418_v34 = vpop.permute.xlu0 %417 }
 0x8be   :  { %v420_v35 = vadd.f32 %v418_v34, %v410_v33 }
 0x8c0   :  { %861 = vtanh.f32 %v420_v35  ;;  %v433_v12 = vsel %vm432_vm1, %v420_v35, %v366_v32  ;;  %v580_v35 = vsel %vm579_vm13, 1, %v947_v2 }
 0x8c6   :  { %v862_v36 = vpop.eup %861 }
 0x8c7   :  { %423 = vrot.lane.b32.xlu1 %v862_v36, %s949_s7 }
 0x8cf   :  { %48 = vperm.xlu1 %829, %v29_v37  }
 0x939   :  { %v424_v39 = vpop.permute.xlu1 %423 }
 0x93a   :  { %v1135_v40 = vmul.f32 %v424_v39, %v407_v30 }
 0x93c   :  { %v434_v41 = vsel %vm432_vm1, %v1135_v40, %v367_v63 }
 0x93d   :  { %v454_v42 = vpack.c.bf16 %v434_v41, %v434_v41 }
 0x93f   :  { %456 = vrot.lane.b32.xlu0 %v454_v42, %s950_s1 }
 0x941   :  { %v49_v43 = vpop.permute.xlu1 %48 }
 0x942   :  { %vm63_vm3 = vcmp.eq.s32.totalorder %v49_v43, %v1024_v7 }
 0x943   :  { %v781_v44 = vsel %vm63_vm3, 1.0, %v948_v9 }
 0x944   :  { %789 = vmatmul.msk.f32.gmra.mxu0 %vm89_vm0, %v781_v44 }
 0x9b1   :  { %v457_v46 = vpop.permute.xlu0 %456 }
 0x9b2   :  { %808 = vmatmul.msk.bf16.vlgmr.msrb.gmra.mxu2 %vm172_vm9, %v457_v46 }
 0x9c1   :  { %v143_v47 = vpop.f32.mrf.mxu0 }
 0x9c2   :  { %v144_v48 = vadd.f32 %v1032_v13, %v143_v47 }
 0xa35   :  { %v470_v49 = vpop.f32.mrf.mxu2 }
 0xa36   :  { %v474_v50 = vadd.f32 %v470_v49, %v144_v48 }
 0xa38   :  { %863 = vtanh.f32 %v474_v50  ;;  %v809_v54 = vmul.f32 -1.442695, %v474_v50 }
 0xa3a   :  { %865 = vpow2.f32 %v809_v54  ;;  %v31_v54 = vld [vmem:[%s1259_s0 + $0x30] sm:$0xff]  ;;  %s951_s0 = smov 96  }
 0xa3d   :  { %v472_v51 = vpop.f32.mrf.mxu2 }
 0xa3e   :  { %v864_v52 = vpop.eup %863 }
 0xa3f   :  { %497 = vrot.lane.b32.xlu2 %v864_v52, %s949_s7 }
 0xa40   :  { %v866_v55 = vpop.eup %865 }
 0xa41   :  { %v478_v56 = vadd.f32 1.0, %v866_v55 }
 0xa43   :  { %867 = vrcp.f32 %v478_v56  ;;  %v490_v0 = vand.u32 2147483648, %v478_v56  ;;  %vm484_vm6 = vweird.f32 %v478_v56  ;;  %v488_v3 = vand.u32 2147483647, %v478_v56 }
 0xa45   :  { %v491_v6 = vor.u32 1.1754944e-38, %v490_v0  ;;  %vm489_vm8 = vcmp.eq.f32.partialorder %v488_v3, 8.507059e+37 }
 0xa47   :  { %515 = vperm.xlu2 %828, %v513_v53  }
 0xa49   :  { %v868_v57 = vpop.eup %867 }
 0xa4a   :  { %v480_v58 = vmul.f32 %v868_v57, %v478_v56  ;;  %vm485_vm5 = vweird.f32 %v868_v57 }
 0xa4b   :  { %vm486_vm7 = vmor %vm484_vm6, %vm485_vm5 }
 0xa4c   :  { %v481_v59 = vsub.f32 1.0, %v480_v58 }
 0xa4e   :  { %v482_v61 = vmul.f32 %v868_v57, %v481_v59 }
 0xa50   :  { %v483_v63 = vadd.f32 %v868_v57, %v482_v61 }
 0xa52   :  { %v487_v5 = vsel %vm486_vm7, %v868_v57, %v483_v63 }
 0xa53   :  { %v492_v10 = vsel %vm489_vm8, %v491_v6, %v487_v5 }
 0xa54   :  { %v495_v14 = vmul.f32 %v492_v10, %v433_v12 }
 0xa99   :  { %v498_v8 = vpop.permute.xlu2 %497 }
 0xa9a   :  { %v500_v11 = vmul.f32 %v498_v8, %v492_v10 }
 0xa9c   :  { %502 = vrot.lane.b32.xlu0 %v500_v11, %s950_s1 }
 0xaa1   :  { %v1157_v19 = vpop.permute.xlu2 %515 }
 0xaa2   :  { %vm517_vm11 = vcmp.eq.s32.totalorder %v1157_v19, 1 }
 0xb0e   :  { %v503_v15 = vpop.permute.xlu0 %502 }
 0xb0f   :  { %v505_v16 = vadd.f32 %v503_v15, %v495_v14 }
 0xb11   :  { %869 = vtanh.f32 %v505_v16  ;;  %v518_v55 = vsel %vm517_vm11, %v505_v16, %v433_v12 }
 0xb17   :  { %v870_v17 = vpop.eup %869 }
 0xb18   :  { %508 = vrot.lane.b32.xlu1 %v870_v17, %s949_s7 }
 0xb20   :  { %51 = vperm.xlu1 %829, %v30_v18  }
 0xb8a   :  { %v509_v20 = vpop.permute.xlu1 %508 }
 0xb8b   :  { %v1159_v22 = vmul.f32 %v509_v20, %v492_v10 }
 0xb8d   :  { %v519_v24 = vsel %vm517_vm11, %v1159_v22, %v434_v41 }
 0xb8e   :  { %v521_v25 = vpack.c.bf16 %v519_v24, %v519_v24 }
 0xb90   :  { %523 = vrot.lane.b32.xlu0 %v521_v25, %s950_s1 }
 0xb92   :  { %v52_v1 = vpop.permute.xlu1 %51 }
 0xb93   :  { %vm64_vm12 = vcmp.eq.s32.totalorder %v52_v1, %v1024_v7 }
 0xb94   :  { %v782_v4 = vsel %vm64_vm12, 1.0, %v948_v9 }
 0xb95   :  { %790 = vmatmul.msk.f32.gmra.mxu0 %vm89_vm0, %v782_v4 }
 0xc02   :  { %v524_v27 = vpop.permute.xlu0 %523 }
 0xc03   :  { %810 = vmatmul.msk.bf16.vlgmr.msra.gmra.mxu3 %vm172_vm9, %v524_v27 }
 0xc12   :  { %v146_v29 = vpop.f32.mrf.mxu0 }
 0xc13   :  { %v147_v30 = vadd.f32 %v1032_v13, %v146_v29 }
 0xc86   :  { %v537_v31 = vpop.f32.mrf.mxu3 }
 0xc87   :  { %v541_v32 = vadd.f32 %v537_v31, %v147_v30 }
 0xc89   :  { %871 = vtanh.f32 %v541_v32  ;;  %v811_v36 = vmul.f32 -1.442695, %v541_v32 }
 0xc8b   :  { %873 = vpow2.f32 %v811_v36 }
 0xc8e   :  { %v539_v33 = vpop.f32.mrf.mxu3 }
 0xc8f   :  { %v872_v34 = vpop.eup %871 }
 0xc90   :  { %564 = vrot.lane.b32.xlu2 %v872_v34, %s949_s7 }
 0xc91   :  { %v874_v37 = vpop.eup %873 }
 0xc92   :  { %v545_v39 = vadd.f32 1.0, %v874_v37 }
 0xc94   :  { %875 = vrcp.f32 %v545_v39  ;;  %v557_v47 = vand.u32 2147483648, %v545_v39  ;;  %vm551_vm15 = vweird.f32 %v545_v39  ;;  %v555_v48 = vand.u32 2147483647, %v545_v39 }
 0xc96   :  { %v558_v50 = vor.u32 1.1754944e-38, %v557_v47  ;;  %vm556_vm4 = vcmp.eq.f32.partialorder %v555_v48, 8.507059e+37 }
 0xc98   :  { %582 = vperm.xlu2 %828, %v580_v35  }
 0xc9a   :  { %v876_v41 = vpop.eup %875 }
 0xc9b   :  { %v547_v42 = vmul.f32 %v876_v41, %v545_v39  ;;  %vm552_vm14 = vweird.f32 %v876_v41 }
 0xc9c   :  { %vm553_vm3 = vmor %vm551_vm15, %vm552_vm14  ;;  %vm713_vm15 = vcmp.gt.s32.totalorder %v1042_v23, 7 }
 0xc9d   :  { %v548_v43 = vsub.f32 1.0, %v547_v42 }
 0xc9f   :  { %v549_v44 = vmul.f32 %v876_v41, %v548_v43 }
 0xca1   :  { %v550_v46 = vadd.f32 %v876_v41, %v549_v44 }
 0xca3   :  { %v554_v49 = vsel %vm553_vm3, %v876_v41, %v550_v46 }
 0xca4   :  { %v559_v52 = vsel %vm556_vm4, %v558_v50, %v554_v49  ;;  %v153_v50 = vadd.f32 %v1032_v13, %v1095_v28 }
 0xca5   :  { %v562_v56 = vmul.f32 %v559_v52, %v518_v55 }
 0xcea   :  { %v565_v51 = vpop.permute.xlu2 %564 }
 0xceb   :  { %v567_v53 = vmul.f32 %v565_v51, %v559_v52 }
 0xced   :  { %569 = vrot.lane.b32.xlu0 %v567_v53, %s950_s1 }
 0xcf2   :  { %v1184_v0 = vpop.permute.xlu2 %582 }
 0xcf3   :  { %vm584_vm6 = vcmp.eq.s32.totalorder %v1184_v0, 1 }
 0xcf5   :  { %54 = vperm.xlu0 %827, %v31_v54  }
 0xd5f   :  { %v570_v57 = vpop.permute.xlu0 %569 }
 0xd60   :  { %v572_v58 = vadd.f32 %v570_v57, %v562_v56  ;;  %v520_v56 = vsel %vm517_vm11, %v1159_v22, 0.0 }
 0xd62   :  { %877 = vtanh.f32 %v572_v58  ;;  %v585_v36 = vsel %vm584_vm6, %v572_v58, %v518_v55  ;;  %v714_v55 = vsel %vm713_vm15, 1, %v947_v2 }
 0xd67   :  { %v55_v59 = vpop.permute.xlu0 %54 }
 0xd68   :  { %v878_v61 = vpop.eup %877  ;;  %vm65_vm5 = vcmp.eq.s32.totalorder %v55_v59, %v1024_v7 }
 0xd69   :  { %v783_v63 = vsel %vm65_vm5, 1.0, %v948_v9  ;;  %575 = vrot.lane.b32.xlu1 %v878_v61, %s949_s7 }
 0xd6a   :  { %791 = vmatmul.msk.f32.gmra.mxu0 %vm89_vm0, %v783_v63  ;;  %vm646_vm0 = vcmp.gt.s32.totalorder %v1042_v23, 6 }
 0xd6b   :  { %v647_v16 = vsel %vm646_vm0, 1, %v947_v2  ;;  %vm451_vm0 = vcmask 785408  }
 0xddb   :  { %v576_v3 = vpop.permute.xlu1 %575 }
 0xddc   :  { %v1186_v5 = vmul.f32 %v576_v3, %v559_v52 }
 0xdde   :  { %v586_v6 = vsel %vm584_vm6, %v1186_v5, %v519_v24 }
 0xddf   :  { %v588_v8 = vpack.c.bf16 %v586_v6, %v586_v6 }
 0xde1   :  { %590 = vrot.lane.b32.xlu1 %v588_v8, %s950_s1 }
 0xde7   :  { %v149_v9 = vpop.f32.mrf.mxu0 }
 0xde8   :  { %v150_v10 = vadd.f32 %v1032_v13, %v149_v9 }
 0xe53   :  { %v591_v7 = vpop.permute.xlu1 %590 }
 0xe54   :  { %812 = vmatmul.msk.bf16.vlgmr.msra.gmra.mxu1 %vm172_vm9, %v591_v7 }
 0xed1   :  { %v604_v11 = vpop.f32.mrf.mxu1 }
 0xed2   :  { %v608_v12 = vadd.f32 %v604_v11, %v150_v10  ;;  %v587_v10 = vsel %vm584_vm6, %v1186_v5, 0.0  ;;  %vm449_vm6 = vcmask 523264  }
 0xed4   :  { %879 = vtanh.f32 %v608_v12  ;;  %v813_v17 = vmul.f32 -1.442695, %v608_v12 }
 0xed6   :  { %881 = vpow2.f32 %v813_v17  ;;  %v301_v17 = vsel %vm298_vm2, %v1086_v26, 0.0 }
 0xed9   :  { %v606_v14 = vpop.f32.mrf.mxu1 }
 0xeda   :  { %v880_v15 = vpop.eup %879 }
 0xedb   :  { %631 = vrot.lane.b32.xlu2 %v880_v15, %s949_s7 }
 0xedc   :  { %v882_v18 = vpop.eup %881 }
 0xedd   :  { %v612_v20 = vadd.f32 1.0, %v882_v18 }
 0xedf   :  { %883 = vrcp.f32 %v612_v20  ;;  %v624_v29 = vand.u32 2147483648, %v612_v20  ;;  %vm618_vm8 = vweird.f32 %v612_v20  ;;  %v622_v30 = vand.u32 2147483647, %v612_v20 }
 0xee1   :  { %v625_v32 = vor.u32 1.1754944e-38, %v624_v29  ;;  %vm623_vm13 = vcmp.eq.f32.partialorder %v622_v30, 8.507059e+37 }
 0xee3   :  { %649 = vperm.xlu2 %828, %v647_v16  }
 0xee5   :  { %v884_v24 = vpop.eup %883 }
 0xee6   :  { %v614_v25 = vmul.f32 %v884_v24, %v612_v20  ;;  %vm619_vm7 = vweird.f32 %v884_v24 }
 0xee7   :  { %vm620_vm12 = vmor %vm618_vm8, %vm619_vm7 }
 0xee8   :  { %v615_v1 = vsub.f32 1.0, %v614_v25 }
 0xeea   :  { %v616_v4 = vmul.f32 %v884_v24, %v615_v1 }
 0xeec   :  { %v617_v27 = vadd.f32 %v884_v24, %v616_v4 }
 0xeee   :  { %v621_v31 = vsel %vm620_vm12, %v884_v24, %v617_v27 }
 0xeef   :  { %v626_v34 = vsel %vm623_vm13, %v625_v32, %v621_v31  ;;  %v435_v31 = vsel %vm432_vm1, %v1135_v40, 0.0 }
 0xef0   :  { %v629_v37 = vmul.f32 %v626_v34, %v585_v36 }
 0xf35   :  { %v632_v33 = vpop.permute.xlu2 %631 }
 0xf36   :  { %v634_v35 = vmul.f32 %v632_v33, %v626_v34 }
 0xf38   :  { %636 = vrot.lane.b32.xlu0 %v634_v35, %s950_s1 }
 0xf3d   :  { %v650_v43 = vpop.permute.xlu2 %649 }
 0xf3e   :  { %vm651_vm14 = vcmp.eq.s32.totalorder %v650_v43, 1 }
 0xfaa   :  { %v637_v39 = vpop.permute.xlu0 %636 }
 0xfab   :  { %v639_v41 = vadd.f32 %v637_v39, %v629_v37 }
 0xfad   :  { %885 = vtanh.f32 %v639_v41  ;;  %v652_v11 = vsel %vm651_vm14, %v639_v41, %v585_v36 }
 0xfb3   :  { %v886_v42 = vpop.eup %885 }
 0xfb4   :  { %642 = vrot.lane.b32.xlu1 %v886_v42, %s949_s7 }
0x1026   :  { %v643_v44 = vpop.permute.xlu1 %642 }
0x1027   :  { %v645_v46 = vmul.f32 %v643_v44, %v626_v34 }
0x1029   :  { %v1203_v47 = vsel %vm651_vm14, %v645_v46, %v586_v6  ;;  %v654_v13 = vsel %vm651_vm14, %v645_v46, 0.0 }
0x102a   :  { %v655_v48 = vpack.c.bf16 %v1203_v47, %v1203_v47 }
0x102c   :  { %657 = vrot.lane.b32.xlu0 %v655_v48, %s950_s1 }
0x109e   :  { %v658_v49 = vpop.permute.xlu0 %657 }
0x109f   :  { %814 = vmatmul.msk.bf16.vlgmr.msra.gmra.mxu2 %vm172_vm9, %v658_v49 }
0x1122   :  { %v671_v51 = vpop.f32.mrf.mxu2 }
0x1123   :  { %v675_v52 = vadd.f32 %v671_v51, %v153_v50 }
0x1125   :  { %887 = vtanh.f32 %v675_v52  ;;  %v815_v28 = vmul.f32 -1.442695, %v675_v52 }
0x1127   :  { %889 = vpow2.f32 %v815_v28 }
0x112a   :  { %v673_v53 = vpop.f32.mrf.mxu2 }
0x112b   :  { %v888_v54 = vpop.eup %887 }
0x112c   :  { %698 = vrot.lane.b32.xlu1 %v888_v54, %s949_s7 }
0x112d   :  { %v890_v57 = vpop.eup %889 }
0x112e   :  { %v679_v58 = vadd.f32 1.0, %v890_v57 }
0x1130   :  { %891 = vrcp.f32 %v679_v58  ;;  %v691_v19 = vand.u32 2147483648, %v679_v58  ;;  %vm685_vm11 = vweird.f32 %v679_v58  ;;  %v689_v22 = vand.u32 2147483647, %v679_v58 }
0x1132   :  { %v692_v6 = vor.u32 1.1754944e-38, %v691_v19  ;;  %vm690_vm5 = vcmp.eq.f32.partialorder %v689_v22, 8.507059e+37 }
0x1134   :  { %716 = vperm.xlu1 %829, %v714_v55  }
0x1136   :  { %v892_v23 = vpop.eup %891 }
0x1137   :  { %v681_v59 = vmul.f32 %v892_v23, %v679_v58  ;;  %vm686_vm3 = vweird.f32 %v892_v23 }
0x1138   :  { %vm687_vm4 = vmor %vm685_vm11, %vm686_vm3 }
0x1139   :  { %v682_v2 = vsub.f32 1.0, %v681_v59 }
0x113b   :  { %v683_v61 = vmul.f32 %v892_v23, %v682_v2 }
0x113c   :  { %723 = vrot.lane.b32.xlu1 %v520_v56, %s950_s1 }
0x113d   :  { %v684_v63 = vadd.f32 %v892_v23, %v683_v61 }
0x113f   :  { %v688_v3 = vsel %vm687_vm4, %v892_v23, %v684_v63 }
0x1140   :  { %v693_v7 = vsel %vm690_vm5, %v692_v6, %v688_v3 }
0x1141   :  { %v696_v12 = vmul.f32 %v693_v7, %v652_v11 }
0x1144   :  { %731 = vrot.lane.b32.xlu1 %v654_v13, %s951_s0 }
0x119e   :  { %v699_v8 = vpop.permute.xlu1 %698 }
0x119f   :  { %v701_v9 = vmul.f32 %v699_v8, %v693_v7 }
0x11a1   :  { %703 = vrot.lane.b32.xlu2 %v701_v9, %s950_s1 }
0x11a6   :  { %v717_v0 = vpop.permute.xlu1 %716 }
0x11a7   :  { %vm718_vm7 = vcmp.eq.s32.totalorder %v717_v0, 1 }
0x11a9   :  { %437 = vrot.lane.b32.xlu2 %v1052_v45, %s950_s1  ;;  %v368_v45 = vsel %vm365_vm10, %v1114_v62, 0.0 }
0x11ae   :  { %v724_v18 = vpop.permute.xlu1 %723 }
0x11b1   :  { %727 = vrot.lane.b32.xlu2 %v587_v10, %s949_s7 }
0x11b6   :  { %v732_v21 = vpop.permute.xlu1 %731 }
0x11fb   :  { %v704_v14 = vpop.permute.xlu2 %703 }
0x11fc   :  { %v706_v15 = vadd.f32 %v704_v14, %v696_v12 }
0x11fe   :  { %893 = vtanh.f32 %v706_v15  ;;  %v719_v34 = vsel %vm718_vm7, %v706_v15, %v652_v11 }
0x1203   :  { %v438_v5 = vpop.permute.xlu2 %437 }
0x1204   :  { %v894_v16 = vpop.eup %893 }
0x1205   :  { %709 = vrot.lane.b32.xlu0 %v894_v16, %s949_s7 }
0x120b   :  { %v728_v20 = vpop.permute.xlu2 %727 }
0x120c   :  { %v734_v24 = vsel %vm172_vm9, %v724_v18, %v728_v20 }
0x120d   :  { %441 = vrot.lane.b32.xlu0 %v301_v17, %s949_s7  ;;  %v735_v26 = vsel %vm449_vm6, %v734_v24, %v732_v21 }
0x1215   :  { %445 = vrot.lane.b32.xlu0 %v368_v45, %s951_s0 }
0x1277   :  { %v710_v25 = vpop.permute.xlu0 %709 }
0x1278   :  { %v712_v1 = vmul.f32 %v710_v25, %v693_v7 }
0x127a   :  { %v721_v4 = vsel %vm718_vm7, %v712_v1, 0.0  ;;  %v720_v60 = vsel %vm718_vm7, %v712_v1, %v1203_v47 }
0x127b   :  { %739 = vrot.lane.b32.xlu2 %v720_v60, %s950_s1  ;;  %v736_v62 = vsel %vm451_vm0, %v735_v26, %v721_v4 }
0x127c   :  { %737 = vst [vmem:[#allocation2 + $0x8] sm:$0xff] %v736_v62 }
0x127f   :  { %v442_v27 = vpop.permute.xlu0 %441 }
0x1280   :  { %v448_v29 = vsel %vm172_vm9, %v438_v5, %v442_v27 }
0x1287   :  { %v446_v30 = vpop.permute.xlu0 %445 }
0x1288   :  { %v450_v32 = vsel %vm449_vm6, %v448_v29, %v446_v30 }
0x1289   :  { %v452_v33 = vsel %vm451_vm0, %v450_v32, %v435_v31 }
0x128a   :  { %453 = vst [vmem:[#allocation2] sm:$0xff] %v452_v33 }
0x128b   :  { %755 = dma.vmem_to_hbm [thread:$0]  %s751_s24, 256, %s753_s27, [#allocation3]  }
0x12d5   :  { %v740_v35 = vpop.permute.xlu2 %739 }
0x12d6   :  { %v742_v38 = vsel %vm172_vm9, %v740_v35, %v719_v34 }
0x12d7   :  { %v743_v40 = vsel %vm449_vm6, %v742_v38, 0.0 }
0x12d8   :  { %744 = vst [vmem:[#allocation4] sm:$0xff] %v743_v40 }
0x12d9   :  { %766 = dma.vmem_to_hbm [thread:$0]  %s762_s3, 128, %s764_s5, [#allocation5]  }
0x12da   :  { %943 = dma.done.wait [#allocation3], 256  }
0x12db   :  { %944 = vsyncadd [#allocation3], 4294967040 }
0x12dc   :  { %945 = dma.done.wait [#allocation5], 128  }
0x12dd   :  { %946 = vsyncadd [#allocation5], 4294967168 }
0x12de   :  { %775 = vsyncpa [#allocation3], 1 }
0x12df   :  { %776 = vsyncpa [#allocation5], 1 }

</bundles_post_ra>
